<compile_context>
chip_gen: v5e
topology: v5e:2x2
jax: 0.10.0
libtpu: 0.0.40
codegen_flags: <defaults>
</compile_context>

<pallas_src>
import numpy as np
import jax
import jax.numpy as jnp
from jax.experimental import pallas as pl
from jax.experimental.pallas import tpu as pltpu

EPS = 1e-5
HIS_GRAD_UPDATE_LR = 1e-4

NUM_STATS = 10        # [cos_m, cos_g, mm, mn, nn, gg, gn, qq, mg, mq]
NUM_CORES = 2         # leading "parallel" grid axis: sharded across v7x TCs,
                      # harmless sequential outer loop on 1-TC chips (v5e/v6e)
TILE_C_MAX = 2048     # 8 x 2048 x 4 B = 64 KiB / input block; 4 inputs double-
                      # buffered = 512 KiB -> fits default scoped VMEM on all gens


# ------------------------------ kernel --------------------------------------

def _make_stats_kernel(num_params, tile_c, chunks_per_core, eps_row):
    """Per-chunk Gram/cosine stats, segment-summed per parameter on the MXU.

    Refs (PrefetchScalarGridSpec, num_scalar_prefetch=1):
      off_ref : SMEM (num_params+1,) int32   cumulative row offsets per param
      hm, nm, hg, ng : VMEM [max_param, tile_c] packed data chunks
      o_ref   : VMEM [1, NUM_STATS, num_params]  per-core partial sums
                (block index constant along the chunk axis -> accumulator)
    """

    def kernel(off_ref, hm_ref, nm_ref, hg_ref, ng_ref, o_ref):
        core = pl.program_id(0)
        chunk = pl.program_id(1)

        @pl.when(chunk == 0)
        def _():
            o_ref[...] = jnp.zeros_like(o_ref)

        hm = hm_ref[...]
        nm = nm_ref[...]
        hg = hg_ref[...]
        ng = ng_ref[...]

        def colsum(a, b):                      # per-row (lane) inner product
            return jnp.sum(a * b, axis=0, keepdims=True)   # [1, tile_c]

        r_mm = colsum(hm, hm)
        r_mn = colsum(hm, nm)
        r_nn = colsum(nm, nm)
        r_gg = colsum(hg, hg)
        r_gn = colsum(hg, ng)
        r_qq = colsum(ng, ng)
        r_mg = colsum(nm, hg)
        r_mq = colsum(nm, ng)

        # Per-row cosine ratios; eps_row = max_param*1e-5 matches torch's
        # sum(x**2 + 1e-5, dim=1) over the padded feature dim.  Padding lanes
        # have r_* == 0 so they contribute exactly 0 to every stat.
        ratio_m = r_mn * jax.lax.rsqrt((r_mm + eps_row) * (r_nn + eps_row))
        ratio_g = r_gn * jax.lax.rsqrt((r_gg + eps_row) * (r_qq + eps_row))

        stats = jnp.concatenate(
            [ratio_m, ratio_g, r_mm, r_mn, r_nn, r_gg, r_gn, r_qq, r_mg, r_mq],
            axis=0)                                          # [10, tile_c]

        # Build the 0/1 row->parameter membership mask in-kernel from the
        # scalar-prefetched offsets (nothing extra shipped from HBM).
        base = (core * chunks_per_core + chunk) * tile_c
        lane = base + jax.lax.broadcasted_iota(jnp.int32, (1, tile_c), 1)
        pid = jnp.zeros((1, tile_c), jnp.int32)
        for p in range(1, num_params + 1):                   # static unroll
            pid = pid + (lane >= off_ref[p]).astype(jnp.int32)
        # padding lanes get pid == num_params -> no row matches below
        seg = (pid == jax.lax.broadcasted_iota(
            jnp.int32, (num_params, tile_c), 0)).astype(jnp.float32)

        # Segment sums on the MXU: stats @ seg^T.  seg is 0/1 and the fp32
        # contraction precision keeps the reduction bit-faithful to f32.
        m = jax.lax.dot_general(
            stats, seg,
            dimension_numbers=(((1,), (1,)), ((), ())),
            precision=jax.lax.Precision.HIGHEST,
            preferred_element_type=jnp.float32)              # [10, P]

        o_ref[...] += m[None, :, :]

    return kernel


# --------------------------------- glue -------------------------------------

def _pad_param(x, max_param):
    x = jnp.asarray(x, jnp.float32)
    if x.ndim == 1:
        x = x[None, :]                        # torch.unsqueeze(dim=0)
    # TODO(synk): params with ndim > 2 (e.g. conv kernels) are not exercised here.
    pad = max_param - x.shape[-1]
    assert pad >= 0, "param feature dim exceeds max_param"
    if pad > 0:
        x = jnp.pad(x, ((0, 0), (0, pad)))    # F.pad(..., (0, max_param - d))
    return x


def regularization_forward(his_grad, his_model, new_grad, new_model,
                           fc_w, fc_b, weight_decay, max_param):
    names = list(new_model.keys())            # PyTorch dict iteration order
    num_params = len(names)
    assert num_params == max_param, "fc_layer requires num_params == max_param"

    rows = [1 if jnp.ndim(new_model[n]) == 1 else int(new_model[n].shape[0])
            for n in names]
    total_rows = int(sum(rows))

    # Lane-chunk tiling: biggest tile up to TILE_C_MAX, multiple of 128 lanes,
    # split evenly over NUM_CORES.  (Sized well inside v5e 16 MiB / v7x 32 MiB
    # default scoped VMEM with 4 double-buffered inputs.)
    per_core_rows = -(-total_rows // NUM_CORES)
    tile_c = min(TILE_C_MAX, max(128, -(-per_core_rows // 128) * 128))
    chunks_per_core = -(-per_core_rows // tile_c)
    c_total = NUM_CORES * chunks_per_core * tile_c

    def pack(d):
        # [max_param, C]: features on sublanes, concatenated rows on lanes.
        cols = [_pad_param(d[n], max_param).T for n in names]
        packed = jnp.concatenate(cols, axis=1)
        return jnp.pad(packed, ((0, 0), (0, c_total - total_rows)))
    # TODO(synk): at MB scale the pack() pass itself rivals the kernel's HBM
    # traffic; cache the packed his_model/his_grad tiles (they change rarely)
    # or make the packed [max_param, C] layout the canonical storage format.

    hm_p = pack(his_model)
    nm_p = pack(new_model)
    hg_p = pack(his_grad)
    ng_p = pack(new_grad)

    off_np = np.zeros((num_params + 1,), np.int32)
    off_np[1:] = np.cumsum(np.asarray(rows, np.int64)).astype(np.int32)
    off = jnp.asarray(off_np)

    kernel = _make_stats_kernel(num_params, tile_c, chunks_per_core,
                                float(max_param) * EPS)

    data_spec = pl.BlockSpec(
        (max_param, tile_c),
        lambda core, chunk, off_ref: (0, core * chunks_per_core + chunk))

    grid_spec = pltpu.PrefetchScalarGridSpec(
        num_scalar_prefetch=1,
        grid=(NUM_CORES, chunks_per_core),
        in_specs=[data_spec] * 4,
        out_specs=pl.BlockSpec((1, NUM_STATS, num_params),
                               lambda core, chunk, off_ref: (core, 0, 0)),
    )

    partial = pl.pallas_call(
        kernel,
        out_shape=jax.ShapeDtypeStruct((NUM_CORES, NUM_STATS, num_params),
                                       jnp.float32),
        grid_spec=grid_spec,
        compiler_params=pltpu.CompilerParams(
            dimension_semantics=("parallel", "arbitrary"),
            vmem_limit_bytes=32 * 1024 * 1024),
    )(off, hm_p, nm_p, hg_p, ng_p)

    # ---- tiny epilogue (O(P^2) flops): combine per-core partials, fc+softmax,
    # ---- closed-form quadratic loss.  No second pass over the data.
    sums = jnp.sum(partial, axis=0)                       # [10, P]
    inv_rows = 1.0 / jnp.asarray(rows, jnp.float32)
    cos_m = sums[0] * inv_rows                            # mean over true rows
    cos_g = sums[1] * inv_rows
    g_mm, g_mn, g_nn = sums[2], sums[3], sums[4]
    g_gg, g_gn, g_qq = sums[5], sums[6], sums[7]
    g_mg, g_mq = sums[8], sums[9]

    fc_w = jnp.asarray(fc_w, jnp.float32)
    fc_b = jnp.asarray(fc_b, jnp.float32)
    lr_m = jax.nn.softmax(cos_m @ fc_w.T + fc_b)
    lr_g = jax.nn.softmax(cos_g @ fc_w.T + fc_b)

    s = HIS_GRAD_UPDATE_LR
    # ||hm + lr_m*nm||^2
    norm_m2 = jnp.maximum(g_mm + 2.0 * lr_m * g_mn + lr_m * lr_m * g_nn, 0.0)
    # v = nm - s*hg ;  ||v - s*lr_g*ng||^2  (derived from the Gram sums)
    g_vv = g_nn - 2.0 * s * g_mg + s * s * g_gg
    g_vq = g_mq - s * g_gn
    norm_g2 = jnp.maximum(
        g_vv - 2.0 * s * lr_g * g_vq + (s * s) * lr_g * lr_g * g_qq, 0.0)
    # TODO(synk): the quadratic expansion can cancel catastrophically if a
    # regularized parameter is much smaller than its components; fall back to a
    # second data pass in that regime if bit-accuracy matters there.
    loss = weight_decay * jnp.sum(jnp.sqrt(norm_m2) + jnp.sqrt(norm_g2))
    return loss


# ---------------------- pure-JAX reference (for check) ----------------------

def _reference_forward(his_grad, his_model, new_grad, new_model,
                       fc_w, fc_b, weight_decay, max_param):
    names = list(new_model.keys())
    hm = {n: _pad_param(his_model[n], max_param) for n in names}
    nm = {n: _pad_param(new_model[n], max_param) for n in names}
    hg = {n: _pad_param(his_grad[n], max_param) for n in names}
    ng = {n: _pad_param(new_grad[n], max_param) for n in names}

    def cos(a, b):
        qn = jnp.sqrt(jnp.sum(a * a + EPS, axis=1))
        dn = jnp.sqrt(jnp.sum(b * b + EPS, axis=1))
        return jnp.mean(jnp.sum(a * b, axis=1) / (qn * dn))

    cm = jnp.stack([cos(hm[n], nm[n]) for n in names])
    cg = jnp.stack([cos(hg[n], ng[n]) for n in names])
    lr_m = jax.nn.softmax(cm @ fc_w.T + fc_b)
    lr_g = jax.nn.softmax(cg @ fc_w.T + fc_b)

    loss = 0.0
    for i, n in enumerate(names):
        reg_m = hm[n] + lr_m[i] * nm[n]
        reg_g = hg[n] + lr_g[i] * ng[n]
        nmu = nm[n] - HIS_GRAD_UPDATE_LR * reg_g
        loss = loss + jnp.sqrt(jnp.sum(nmu ** 2)) + jnp.sqrt(jnp.sum(reg_m ** 2))
    return weight_decay * loss


# ---------------------------------- main -------------------------------------

if __name__ == "__main__":
    key = jax.random.PRNGKey(0)
    max_param = 8          # fc_layer requires num_params == max_param
    weight_decay = 0.01

    param_shapes = {
        "rec.layer1.weight": (16, 8),
        "rec.layer1.bias": (8,),
        "rec.layer2.weight": (16, 4),
        "rec.layer2.bias": (4,),
        "rec.layer3.weight": (8, 8),
        "rec.layer3.bias": (8,),
        "adaptor.proj.weight": (4, 6),
        "adaptor.proj.bias": (6,),
    }
    assert len(param_shapes) == max_param

    def make_dict(k):
        d = {}
        for name, shp in param_shapes.items():
            k, sub = jax.random.split(k)
            d[name] = jax.random.normal(sub, shp, dtype=jnp.float32) * 0.1
        return d, k

    his_grad, key = make_dict(key)
    his_model, key = make_dict(key)
    new_grad, key = make_dict(key)
    new_model, key = make_dict(key)

    key, kw, kb = jax.random.split(key, 3)
    bound = 1.0 / (max_param ** 0.5)
    fc_w = jax.random.uniform(kw, (max_param, max_param), jnp.float32, -bound, bound)
    fc_b = jax.random.uniform(kb, (max_param,), jnp.float32, -bound, bound)

    out = regularization_forward(his_grad, his_model, new_grad, new_model,
                                 fc_w, fc_b, weight_decay, max_param)
    out = jax.block_until_ready(out)

    ref = _reference_forward(his_grad, his_model, new_grad, new_model,
                             fc_w, fc_b, weight_decay, max_param)
    assert jnp.allclose(out, ref, rtol=1e-4, atol=1e-5), (float(out), float(ref))

    print("KERNEL_OK")
</pallas_src>

<mosaic_0001>
module attributes {stable_mosaic.version = 11 : i64} {
  func.func @kernel(%arg0: i32, %arg1: i32, %arg2: memref<9xi32, #tpu.memory_space<smem>>, %arg3: memref<8x128xf32, #tpu.memory_space<vmem>>, %arg4: memref<8x128xf32, #tpu.memory_space<vmem>>, %arg5: memref<8x128xf32, #tpu.memory_space<vmem>>, %arg6: memref<8x128xf32, #tpu.memory_space<vmem>>, %arg7: memref<1x10x8xf32, #tpu.memory_space<vmem>>) attributes {dimension_semantics = [#tpu.dimension_semantics<parallel>, #tpu.dimension_semantics<arbitrary>], iteration_bounds = array<i64: 2, 1>, scalar_prefetch = 1 : i64, scratch_operands = 0 : i64, tpu.core_type = #tpu.core_type<tc>, window_params = [{transform_indices = @transform_0, window_bounds = array<i64: 8, 128>}, {transform_indices = @transform_1, window_bounds = array<i64: 8, 128>}, {transform_indices = @transform_2, window_bounds = array<i64: 8, 128>}, {transform_indices = @transform_3, window_bounds = array<i64: 8, 128>}, {transform_indices = @transform_4, window_bounds = array<i64: 1, 10, 8>}]} {
    %c0_i32 = arith.constant 0 : i32
    %0 = arith.cmpi eq, %arg1, %c0_i32 : i32
    %1 = arith.extui %0 : i1 to i32
    %c0_i32_0 = arith.constant 0 : i32
    %2 = arith.cmpi ne, %1, %c0_i32_0 : i32
    scf.if %2 {
      %cst_27 = arith.constant 0.000000e+00 : f32
      %103 = vector.broadcast %cst_27 : f32 to vector<1x10x8xf32>
      %c0_28 = arith.constant 0 : index
      %c0_29 = arith.constant 0 : index
      %c0_30 = arith.constant 0 : index
      %104 = vector.load %arg7[%c0_28, %c0_29, %c0_30] : memref<1x10x8xf32, #tpu.memory_space<vmem>>, vector<1x10x8xf32>
      tpu.vector_store %arg7[%c0_28, %c0_29, %c0_30], %103 {strides = array<i32>} : memref<1x10x8xf32, #tpu.memory_space<vmem>>, vector<1x10x8xf32>,
    } else {
    }
    %c0 = arith.constant 0 : index
    %c0_1 = arith.constant 0 : index
    %3 = vector.load %arg3[%c0, %c0_1] : memref<8x128xf32, #tpu.memory_space<vmem>>, vector<8x128xf32>
    %c0_2 = arith.constant 0 : index
    %c0_3 = arith.constant 0 : index
    %4 = vector.load %arg4[%c0_2, %c0_3] : memref<8x128xf32, #tpu.memory_space<vmem>>, vector<8x128xf32>
    %c0_4 = arith.constant 0 : index
    %c0_5 = arith.constant 0 : index
    %5 = vector.load %arg5[%c0_4, %c0_5] : memref<8x128xf32, #tpu.memory_space<vmem>>, vector<8x128xf32>
    %c0_6 = arith.constant 0 : index
    %c0_7 = arith.constant 0 : index
    %6 = vector.load %arg6[%c0_6, %c0_7] : memref<8x128xf32, #tpu.memory_space<vmem>>, vector<8x128xf32>
    %7 = arith.mulf %3, %3 : vector<8x128xf32>
    %cst = arith.constant dense<0.000000e+00> : vector<128xf32>
    %8 = vector.multi_reduction <add>, %7, %cst [0] : vector<8x128xf32> to vector<128xf32>
    %9 = vector.shape_cast %8 : vector<128xf32> to vector<1x128xf32>
    %10 = arith.mulf %3, %4 : vector<8x128xf32>
    %cst_8 = arith.constant dense<0.000000e+00> : vector<128xf32>
    %11 = vector.multi_reduction <add>, %10, %cst_8 [0] : vector<8x128xf32> to vector<128xf32>
    %12 = vector.shape_cast %11 : vector<128xf32> to vector<1x128xf32>
    %13 = arith.mulf %4, %4 : vector<8x128xf32>
    %cst_9 = arith.constant dense<0.000000e+00> : vector<128xf32>
    %14 = vector.multi_reduction <add>, %13, %cst_9 [0] : vector<8x128xf32> to vector<128xf32>
    %15 = vector.shape_cast %14 : vector<128xf32> to vector<1x128xf32>
    %16 = arith.mulf %5, %5 : vector<8x128xf32>
    %cst_10 = arith.constant dense<0.000000e+00> : vector<128xf32>
    %17 = vector.multi_reduction <add>, %16, %cst_10 [0] : vector<8x128xf32> to vector<128xf32>
    %18 = vector.shape_cast %17 : vector<128xf32> to vector<1x128xf32>
    %19 = arith.mulf %5, %6 : vector<8x128xf32>
    %cst_11 = arith.constant dense<0.000000e+00> : vector<128xf32>
    %20 = vector.multi_reduction <add>, %19, %cst_11 [0] : vector<8x128xf32> to vector<128xf32>
    %21 = vector.shape_cast %20 : vector<128xf32> to vector<1x128xf32>
    %22 = arith.mulf %6, %6 : vector<8x128xf32>
    %cst_12 = arith.constant dense<0.000000e+00> : vector<128xf32>
    %23 = vector.multi_reduction <add>, %22, %cst_12 [0] : vector<8x128xf32> to vector<128xf32>
    %24 = vector.shape_cast %23 : vector<128xf32> to vector<1x128xf32>
    %25 = arith.mulf %4, %5 : vector<8x128xf32>
    %cst_13 = arith.constant dense<0.000000e+00> : vector<128xf32>
    %26 = vector.multi_reduction <add>, %25, %cst_13 [0] : vector<8x128xf32> to vector<128xf32>
    %27 = vector.shape_cast %26 : vector<128xf32> to vector<1x128xf32>
    %28 = arith.mulf %4, %6 : vector<8x128xf32>
    %cst_14 = arith.constant dense<0.000000e+00> : vector<128xf32>
    %29 = vector.multi_reduction <add>, %28, %cst_14 [0] : vector<8x128xf32> to vector<128xf32>
    %30 = vector.shape_cast %29 : vector<128xf32> to vector<1x128xf32>
    %cst_15 = arith.constant 8.000000e-05 : f32
    %31 = vector.broadcast %cst_15 : f32 to vector<1x128xf32>
    %32 = arith.addf %9, %31 : vector<1x128xf32>
    %cst_16 = arith.constant 8.000000e-05 : f32
    %33 = vector.broadcast %cst_16 : f32 to vector<1x128xf32>
    %34 = arith.addf %15, %33 : vector<1x128xf32>
    %35 = arith.mulf %32, %34 : vector<1x128xf32>
    %36 = math.rsqrt %35 : vector<1x128xf32>
    %37 = arith.mulf %12, %36 : vector<1x128xf32>
    %cst_17 = arith.constant 8.000000e-05 : f32
    %38 = vector.broadcast %cst_17 : f32 to vector<1x128xf32>
    %39 = arith.addf %18, %38 : vector<1x128xf32>
    %cst_18 = arith.constant 8.000000e-05 : f32
    %40 = vector.broadcast %cst_18 : f32 to vector<1x128xf32>
    %41 = arith.addf %24, %40 : vector<1x128xf32>
    %42 = arith.mulf %39, %41 : vector<1x128xf32>
    %43 = math.rsqrt %42 : vector<1x128xf32>
    %44 = arith.mulf %21, %43 : vector<1x128xf32>
    %45 = tpu.concatenate %37, %44, %9, %12, %15, %18, %21, %24, %27, %30 in 0 : vector<1x128xf32>, vector<1x128xf32>, vector<1x128xf32>, vector<1x128xf32>, vector<1x128xf32>, vector<1x128xf32>, vector<1x128xf32>, vector<1x128xf32>, vector<1x128xf32>, vector<1x128xf32> -> vector<10x128xf32>
    %c1_i32 = arith.constant 1 : i32
    %46 = arith.muli %arg0, %c1_i32 : i32
    %47 = arith.addi %46, %arg1 : i32
    %c128_i32 = arith.constant 128 : i32
    %48 = arith.muli %47, %c128_i32 : i32
    %49 = tpu.iota {dimensions = array<i32: 1>} : vector<1x128xi32>
    %50 = vector.broadcast %48 : i32 to vector<1x128xi32>
    %51 = arith.addi %50, %49 : vector<1x128xi32>
    %c0_i32_19 = arith.constant 0 : i32
    %52 = vector.broadcast %c0_i32_19 : i32 to vector<1x128xi32>
    %c1 = arith.constant 1 : index
    %53 = memref.load %arg2[%c1] : memref<9xi32, #tpu.memory_space<smem>>
    %54 = vector.broadcast %53 : i32 to vector<1x128xi32>
    %55 = arith.cmpi sge, %51, %54 : vector<1x128xi32>
    %56 = arith.extui %55 : vector<1x128xi1> to vector<1x128xi32>
    %57 = arith.addi %52, %56 : vector<1x128xi32>
    %c2 = arith.constant 2 : index
    %58 = memref.load %arg2[%c2] : memref<9xi32, #tpu.memory_space<smem>>
    %59 = vector.broadcast %58 : i32 to vector<1x128xi32>
    %60 = arith.cmpi sge, %51, %59 : vector<1x128xi32>
    %61 = arith.extui %60 : vector<1x128xi1> to vector<1x128xi32>
    %62 = arith.addi %57, %61 : vector<1x128xi32>
    %c3 = arith.constant 3 : index
    %63 = memref.load %arg2[%c3] : memref<9xi32, #tpu.memory_space<smem>>
    %64 = vector.broadcast %63 : i32 to vector<1x128xi32>
    %65 = arith.cmpi sge, %51, %64 : vector<1x128xi32>
    %66 = arith.extui %65 : vector<1x128xi1> to vector<1x128xi32>
    %67 = arith.addi %62, %66 : vector<1x128xi32>
    %c4 = arith.constant 4 : index
    %68 = memref.load %arg2[%c4] : memref<9xi32, #tpu.memory_space<smem>>
    %69 = vector.broadcast %68 : i32 to vector<1x128xi32>
    %70 = arith.cmpi sge, %51, %69 : vector<1x128xi32>
    %71 = arith.extui %70 : vector<1x128xi1> to vector<1x128xi32>
    %72 = arith.addi %67, %71 : vector<1x128xi32>
    %c5 = arith.constant 5 : index
    %73 = memref.load %arg2[%c5] : memref<9xi32, #tpu.memory_space<smem>>
    %74 = vector.broadcast %73 : i32 to vector<1x128xi32>
    %75 = arith.cmpi sge, %51, %74 : vector<1x128xi32>
    %76 = arith.extui %75 : vector<1x128xi1> to vector<1x128xi32>
    %77 = arith.addi %72, %76 : vector<1x128xi32>
    %c6 = arith.constant 6 : index
    %78 = memref.load %arg2[%c6] : memref<9xi32, #tpu.memory_space<smem>>
    %79 = vector.broadcast %78 : i32 to vector<1x128xi32>
    %80 = arith.cmpi sge, %51, %79 : vector<1x128xi32>
    %81 = arith.extui %80 : vector<1x128xi1> to vector<1x128xi32>
    %82 = arith.addi %77, %81 : vector<1x128xi32>
    %c7 = arith.constant 7 : index
    %83 = memref.load %arg2[%c7] : memref<9xi32, #tpu.memory_space<smem>>
    %84 = vector.broadcast %83 : i32 to vector<1x128xi32>
    %85 = arith.cmpi sge, %51, %84 : vector<1x128xi32>
    %86 = arith.extui %85 : vector<1x128xi1> to vector<1x128xi32>
    %87 = arith.addi %82, %86 : vector<1x128xi32>
    %c8 = arith.constant 8 : index
    %88 = memref.load %arg2[%c8] : memref<9xi32, #tpu.memory_space<smem>>
    %89 = vector.broadcast %88 : i32 to vector<1x128xi32>
    %90 = arith.cmpi sge, %51, %89 : vector<1x128xi32>
    %91 = arith.extui %90 : vector<1x128xi1> to vector<1x128xi32>
    %92 = arith.addi %87, %91 : vector<1x128xi32>
    %93 = tpu.iota {dimensions = array<i32: 0>} : vector<8x128xi32>
    %94 = vector.broadcast %92 : vector<1x128xi32> to vector<8x128xi32>
    %95 = arith.cmpi eq, %94, %93 : vector<8x128xi32>
    %96 = arith.extui %95 : vector<8x128xi1> to vector<8x128xi32>
    %97 = arith.sitofp %96 : vector<8x128xi32> to vector<8x128xf32>
    %cst_20 = arith.constant dense<0.000000e+00> : vector<10x8xf32>
    %98 = tpu.matmul %45, %97, %cst_20 {dimension_numbers = #tpu.dot_dimension_numbers<[1], [1], [0], [0], [0, 0, 1, 0], [], []>, precision = #tpu.contract_precision<fp32>} : vector<10x128xf32>, vector<8x128xf32>, vector<10x8xf32> -> vector<10x8xf32>
    %c0_21 = arith.constant 0 : index
    %c0_22 = arith.constant 0 : index
    %c0_23 = arith.constant 0 : index
    %99 = vector.load %arg7[%c0_21, %c0_22, %c0_23] : memref<1x10x8xf32, #tpu.memory_space<vmem>>, vector<1x10x8xf32>
    %100 = vector.shape_cast %98 : vector<10x8xf32> to vector<1x10x8xf32>
    %101 = arith.addf %99, %100 : vector<1x10x8xf32>
    %c0_24 = arith.constant 0 : index
    %c0_25 = arith.constant 0 : index
    %c0_26 = arith.constant 0 : index
    %102 = vector.load %arg7[%c0_24, %c0_25, %c0_26] : memref<1x10x8xf32, #tpu.memory_space<vmem>>, vector<1x10x8xf32>
    tpu.vector_store %arg7[%c0_24, %c0_25, %c0_26], %101 {strides = array<i32>} : memref<1x10x8xf32, #tpu.memory_space<vmem>>, vector<1x10x8xf32>,
    return
  }
  func.func @transform_0(%arg0: i32, %arg1: i32, %arg2: memref<9xi32, #tpu.memory_space<smem>>) -> (i32, i32) {
    %c1_i32 = arith.constant 1 : i32
    %0 = arith.muli %arg0, %c1_i32 : i32
    %1 = arith.addi %0, %arg1 : i32
    %c0_i32 = arith.constant 0 : i32
    %c0_i32_0 = arith.constant 0 : i32
    return %c0_i32, %1 : i32, i32
  }
  func.func @transform_1(%arg0: i32, %arg1: i32, %arg2: memref<9xi32, #tpu.memory_space<smem>>) -> (i32, i32) {
    %c1_i32 = arith.constant 1 : i32
    %0 = arith.muli %arg0, %c1_i32 : i32
    %1 = arith.addi %0, %arg1 : i32
    %c0_i32 = arith.constant 0 : i32
    %c0_i32_0 = arith.constant 0 : i32
    return %c0_i32, %1 : i32, i32
  }
  func.func @transform_2(%arg0: i32, %arg1: i32, %arg2: memref<9xi32, #tpu.memory_space<smem>>) -> (i32, i32) {
    %c1_i32 = arith.constant 1 : i32
    %0 = arith.muli %arg0, %c1_i32 : i32
    %1 = arith.addi %0, %arg1 : i32
    %c0_i32 = arith.constant 0 : i32
    %c0_i32_0 = arith.constant 0 : i32
    return %c0_i32, %1 : i32, i32
  }
  func.func @transform_3(%arg0: i32, %arg1: i32, %arg2: memref<9xi32, #tpu.memory_space<smem>>) -> (i32, i32) {
    %c1_i32 = arith.constant 1 : i32
    %0 = arith.muli %arg0, %c1_i32 : i32
    %1 = arith.addi %0, %arg1 : i32
    %c0_i32 = arith.constant 0 : i32
    %c0_i32_0 = arith.constant 0 : i32
    return %c0_i32, %1 : i32, i32
  }
  func.func @transform_4(%arg0: i32, %arg1: i32, %arg2: memref<9xi32, #tpu.memory_space<smem>>) -> (i32, i32, i32) {
    %c0_i32 = arith.constant 0 : i32
    %c0_i32_0 = arith.constant 0 : i32
    %c0_i32_1 = arith.constant 0 : i32
    return %arg0, %c0_i32, %c0_i32_0 : i32, i32, i32
  }
}

</mosaic_0001>

<bundles_post_ra>
// kernel: tpu_custom_call.1
= control target key start
LH: loop header
LB: loop body
LE: loop exit
PB: predicated region body
PF: predicated region fallthrough
CT: control target
= control target key end

     0   :  { %s1168_s21 = smov [#allocation3]   ;;  %s1443_s0 = inlined_call_operand.hbm [shape: s32[9], index: 0, kind: input, shape index: {}]   ;;  %s1444_s1 = inlined_call_operand.hbm [shape: f32[8,256], index: 1, kind: input, shape index: {}]   ;;  %s1445_s2 = inlined_call_operand.hbm [shape: f32[8,256], index: 2, kind: input, shape index: {}]   ;;  %s1446_s3 = inlined_call_operand.hbm [shape: f32[8,256], index: 3, kind: input, shape index: {}]   ;;  %s1447_s4 = inlined_call_operand.hbm [shape: f32[8,256], index: 4, kind: input, shape index: {}]   ;;  %s1448_s5 = inlined_call_operand.vmem [shape: f32[2,10,8], index: 5, kind: output, shape index: {}]  }
   0x1   :  { %1451 = sst [smem:[#allocation16_spill]] %s1444_s1  ;;  %s11_s20 = sshll.u32 %s1443_s0, 4  ;;  %s12_s20 = int_to_ptr.hbm [resolvable:$true] %s11_s20 }
   0x2   :  { %1452 = sst [smem:[#allocation17_spill]] %s1445_s2 }
   0x3   :  { %14 = dma.hbm_to_smem %s12_s20, 16, %s1168_s21, [#allocation2] }
   0x4   :  { %1130 = dma.done.wait [#allocation2], 16 }
   0x5   :  { %1131 = vsyncadd [#allocation2], 4294967280 }
   0x6   :  { %17 = sfence }
   0x7   :  { %18 = vsyncpa [#allocation5], 0 }
   0x8   :  { %20 = vsyncpa [#allocation5 + $0x1], 0 }
   0x9   :  { %21 = vsyncpa [#allocation7], 0 }
   0xa   :  { %23 = vsyncpa [#allocation7 + $0x1], 0 }
   0xb   :  { %24 = vsyncpa [#allocation10], 0 }
   0xc   :  { %26 = vsyncpa [#allocation10 + $0x1], 0  ;;  %s1205_s22 = smov 0   ;;  %s1207_s23 = smov 0  }
   0xd   :  { %s1209_s24 = smov 0   ;;  %s1211_s25 = smov 0  }
   0xe   :  { %s1213_s0 = smov 0   ;;  %s1215_s26 = smov 0  }
   0xf LB: > { %s1449_s27 = sadd.s32 4294967295, %s1166_s26   ;;  %s44_s28 = sadd.s32 1, %s1162_s0  ;;  %s1166_s26 = sphi %s1215_s26, %s32_s26   ;;  %s1162_s0 = sphi %s1213_s0, %s1467_s0   ;;  %s1158_s25 = sphi %s1211_s25, %s1466_s25   ;;  %s1154_s24 = sphi %s1209_s24, %s1465_s24   ;;  %s1150_s23 = sphi %s1207_s23, %s1464_s23   ;;  %s1146_s22 = sphi %s1205_s22, %s1463_s22  }
  0x10   : > { %p46_p0 = scmp.ge.s32.totalorder %s44_s28, 2  ;;  %s53_s29 = sadd.s32 1, %s1154_s24 }
  0x11   : > { %p60_p1 = scmp.ne.s32.totalorder %s1154_s24, %s1150_s23  ;;  %p61_p2 = scmp.eq.s32.totalorder %s1166_s26, 0 }
  0x12   : > { %s1469_s28 = smov (%p46_p0, %s44_s28), 0  ;;  %p66_p4 = scmp.ne.s32.totalorder %s1150_s23, %s1146_s22 }
  0x13   : > { %1453 = sst [smem:[#allocation15_spill]] %s1469_s28  ;;  %p62_p3 = por %p61_p2, %p60_p1 }
  0x14   : > { %s50_s30 = ssub.s32 %s1162_s0, %s1469_s28  ;;  %p67_p5 = scmp.eq.s32.totalorder %s1449_s27, 0 }
  0x15   : > { %p51_p6 = scmp.eq.s32.totalorder %s50_s30, 0  ;;  %p917_p8 = scmp.lt.s32.totalorder %s1166_s26, 2 }
  0x16   : > { %p1246_p7 = por %p67_p5, %p66_p4  ;;  %s1255_s8 = sand.u32 1, %s1154_s24  }
  0x17   : > { %s1252_s7 = scalar_select %p51_p6, %s1154_s24, %s53_s29  }
  0x18   : > { %s1258_s9 = sshll.u32 %s1162_s0, 3  ;;  %s1261_s10 = sshll.u32 %s1255_s8, 3 }
  0x19   : > { %p1263_p9 = pnand %p917_p8, %p62_p3  ;;  %s220_s12 = sand.u32 1, %s1166_s26  }
  0x1a   : > { %s1456_s2 = sld [smem:[#allocation17_spill]]  ;;  %s224_s16 = scalar_lea.vmem [#allocation6], %s1261_s10 }
  0x1b   : > { %s233_s17 = sshll.u32 %s224_s16, 4  ;;  %p871_p10 = scmp.ge.s32.totalorder %s1166_s26, 1  ;;  %s234_s17 = int_to_ptr.vmem [resolvable:$true] %s233_s17 }
  0x1c   : > { %s221_s19 = scalar_lea.sflag [#allocation7], %s220_s12  ;;  %p278_p11 = scmp.lt.s32.totalorder %s1166_s26, 3 }
  0x1d   : > { %s1458_s1 = sld [smem:[#allocation16_spill]]  ;;  %s204_s30 = scalar_lea.vmem [#allocation4], %s1261_s10 }
  0x1e   : > { %p1277_p12 = pnand %p871_p10, %p278_p11  ;;  %s213_s13 = sshll.u32 %s204_s30, 4  ;;  %s214_s13 = int_to_ptr.vmem [resolvable:$true] %s213_s13 }
  0x1f   : > { %s201_s12 = scalar_lea.sflag [#allocation5], %s1255_s8  ;;  %s269_s30 = scalar_lea.hbm %s1447_s4, %s1258_s9 }
  0x20   : > { %s229_s15 = scalar_lea.hbm %s1456_s2, %s1258_s9  ;;  %s264_s2 = scalar_lea.vmem [#allocation9], %s1261_s10 }
  0x21   : > { %s231_s18 = sshll.u32 %s229_s15, 4  ;;  %s273_s28 = sshll.u32 %s264_s2, 4  ;;  %s232_s18 = int_to_ptr.hbm [resolvable:$true] %s231_s18  ;;  %s274_s28 = int_to_ptr.vmem [resolvable:$true] %s273_s28 }
  0x22   : > { %910 = dma.hbm_to_vmem [thread:$0]  (!%p1263_p9), %s232_s18, 128, %s234_s17, %s221_s19  }
  0x23   : > { %s209_s29 = scalar_lea.hbm %s1458_s1, %s1258_s9  ;;  %s249_s17 = scalar_lea.hbm %s1446_s3, %s1258_s9 }
  0x24   : > { %s211_s14 = sshll.u32 %s209_s29, 4  ;;  %s244_s18 = scalar_lea.vmem [#allocation8], %s1261_s10  ;;  %s212_s14 = int_to_ptr.hbm [resolvable:$true] %s211_s14 }
  0x25   : > { %907 = dma.hbm_to_vmem [thread:$0]  (!%p1263_p9), %s212_s14, 128, %s214_s13, %s201_s12  }
  0x26   : > { %s253_s27 = sshll.u32 %s244_s18, 4  ;;  %s251_s21 = sshll.u32 %s249_s17, 4  ;;  %s254_s27 = int_to_ptr.vmem [resolvable:$true] %s253_s27  ;;  %s252_s21 = int_to_ptr.hbm [resolvable:$true] %s251_s21 }
  0x27   : > { %913 = dma.hbm_to_vmem [thread:$0]  (!%p1263_p9), %s252_s21, 128, %s254_s27, %s221_s19  }
  0x28   : > { %s271_s1 = sshll.u32 %s269_s30, 4  ;;  %s261_s13 = scalar_lea.sflag [#allocation10], %s1255_s8  ;;  %s272_s1 = int_to_ptr.hbm [resolvable:$true] %s271_s1 }
  0x29   : > { %916 = dma.hbm_to_vmem [thread:$0]  (!%p1263_p9), %s272_s1, 128, %s274_s28, %s261_s13  }
  0x2a   : > { %282 = sbr.rel (%p1277_p12) target bundleno = 272 (0x110), region = 36  ;;  %s284_s14 = sand.u32 (!%p1277_p12), 1, %s1150_s23  }
  0x2b   : > { %s1307_s12 = sshll.u32 (!%p1277_p12), %s284_s14, 3  ;;  %s285_s27 = scalar_lea.sflag (!%p1277_p12), [#allocation5], %s284_s14 }
  0x2c   : > { %s288_s19 = scalar_lea.vmem (!%p1277_p12), [#allocation4], %s1307_s12 }
  0x2f   : > { %1133 = dma.done.wait (%p1246_p7), %s285_s27, 128  }
  0x30   : > { %1135 = vsyncadd (%p1246_p7), %s285_s27, 4294967168  ;;  %s1459_s2 = sadd.s32 4294967295, %s1166_s26   ;;  %s298_s8 = scalar_lea.vmem [#allocation6], %s1307_s12 }
  0x31   : > { %s294_s1 = sand.u32 1, %s1459_s2  }
  0x32   : > { %s295_s28 = scalar_lea.sflag [#allocation7], %s294_s1 }
  0x33   : > { %1137 = dma.done.wait (%p1246_p7), %s295_s28, 256  }
  0x34   : > { %1139 = vsyncadd (%p1246_p7), %s295_s28, 4294967040  ;;  %s308_s9 = scalar_lea.vmem [#allocation8], %s1307_s12  ;;  %s315_s10 = scalar_lea.sflag [#allocation10], %s284_s14 }
  0x35   : > { %s318_s11 = scalar_lea.vmem [#allocation9], %s1307_s12 }
  0x36   : > { %1141 = dma.done.wait (%p1246_p7), %s315_s10, 128  }
  0x37   : > { %1143 = vsyncadd (%p1246_p7), %s315_s10, 4294967168  ;;  %s878_s20 = sshll.u32 %s1158_s25, 7  ;;  %v481_v0 = vlaneseq  ;;  %s879_s15 = sld [smem:[#allocation3 + $0x1]]  ;;  %v1331_v5 = vld [vmem:[%s298_s8] sm:$0xff]  ;;  %v1333_v6 = vld [vmem:[%s308_s9] sm:$0xff]  ;;  %v1169_v12 = vmov 0  }
  0x38   : > { %v483_v1 = vstv %s878_s20  ;;  %s880_s16 = sld [smem:[#allocation3 + $0x2]]  ;;  %v1335_v7 = vld [vmem:[%s318_s11] sm:$0xff]  ;;  %v422_v9 = vmul.f32 %v1333_v6, %v1331_v5  ;;  %v1345_v11 = vld [vmem:[%s288_s19] sm:$0xff]  ;;  %v394_v37 = vmul.f32 %v1331_v5, %v1331_v5  ;;  %v401_v38 = vmul.f32 %v1333_v6, %v1333_v6  ;;  %p363_p13 = scmp.lt.s32.totalorder %s1158_s25, 1 }
  0x39   : > { %v482_v2 = vand.u32 127, %v481_v0  ;;  %s881_s17 = sld [smem:[#allocation3 + $0x3]]  ;;  %v429_v10 = vmul.f32 %v1335_v7, %v1331_v5  ;;  %v380_v15 = vmul.f32 %v1345_v11, %v1345_v11  ;;  %v525_v47 = vshrl.u32 %v481_v0, 7 }
  0x3a   : > { %s882_s18 = sld [smem:[#allocation3 + $0x4]]  ;;  %v423_v18 = vrot.slane %v422_v9, 4  ;;  %v395_v44 = vrot.slane %v394_v37, 4  ;;  %v402_v45 = vrot.slane %v401_v38, 4  ;;  %v415_v55 = vmul.f32 %v1335_v7, %v1335_v7  ;;  %s1471_s25 = smov (!%p363_p13, %s1158_s25), 1 }
  0x3b   : > { %v484_v3 = vadd.s32 %v483_v1, %v482_v2  ;;  %s883_s21 = sld [smem:[#allocation3 + $0x5]]  ;;  %v430_v31 = vrot.slane %v429_v10, 4  ;;  %v381_v34 = vrot.slane %v380_v15, 4  ;;  %vm464_vm8 = vcmask 1040384   ;;  %s893_s30 = sshll.u32 %s1471_s25, 4 }
  0x3c   : > { %s884_s22 = sld [smem:[#allocation3 + $0x6]]  ;;  %v424_v24 = vadd.f32 %v423_v18, %v422_v9  ;;  %v396_v51 = vadd.f32 %v395_v44, %v394_v37  ;;  %v403_v52 = vadd.f32 %v402_v45, %v401_v38  ;;  %v416_v61 = vrot.slane %v415_v55, 4  ;;  %s1411_s12 = scalar_lea.vmem %s1448_s5, %s893_s30 }
  0x3d   : > { %v486_v4 = vstv %s879_s15  ;;  %s1329_s29 = sld [smem:[#allocation3 + $0x7]]  ;;  %v431_v36 = vadd.f32 %v430_v31, %v429_v10  ;;  %v382_v41 = vadd.f32 %v381_v34, %v380_v15  ;;  %v1170_v2 = vmov 1.0  }
  0x3e   : > { %vm487_vm0 = vcmp.ge.s32.totalorder %v484_v3, %v486_v4  ;;  %v490_v8 = vstv %s880_s16  ;;  %s1337_s6 = sld [smem:[#allocation3 + $0x8]]  ;;  %v425_v29 = vrot.slane %v424_v24, 2  ;;  %v397_v58 = vrot.slane %v396_v51, 2 }
  0x3f   : > { %v488_v13 = vsel %vm487_vm0, 1, %v1169_v12  ;;  %vm491_vm1 = vcmp.ge.s32.totalorder %v484_v3, %v490_v8  ;;  %v495_v14 = vstv %s881_s17  ;;  %v432_v43 = vrot.slane %v431_v36, 2 }
  0x40   : > { %v492_v16 = vsel %vm491_vm1, 1, %v1169_v12  ;;  %vm496_vm2 = vcmp.ge.s32.totalorder %v484_v3, %v495_v14  ;;  %v500_v17 = vstv %s882_s18  ;;  %v426_v33 = vadd.f32 %v425_v29, %v424_v24 }
  0x41   : > { %v493_v19 = vadd.s32 %v492_v16, %v488_v13  ;;  %v497_v20 = vsel %vm496_vm2, 1, %v1169_v12  ;;  %vm501_vm3 = vcmp.ge.s32.totalorder %v484_v3, %v500_v17  ;;  %v505_v21 = vstv %s883_s21 }
  0x42   : > { %v502_v22 = vsel %vm501_vm3, 1, %v1169_v12  ;;  %vm506_vm4 = vcmp.ge.s32.totalorder %v484_v3, %v505_v21  ;;  %v510_v23 = vstv %s884_s22  ;;  %v427_v40 = vrot.slane %v426_v33, 1 }
  0x43   : > { %v498_v25 = vadd.s32 %v497_v20, %v493_v19  ;;  %vm511_vm5 = vcmp.ge.s32.totalorder %v484_v3, %v510_v23  ;;  %v515_v26 = vstv %s1329_s29  ;;  %v507_v27 = vsel %vm506_vm4, 1, %v1169_v12 }
  0x44   : > { %v520_v28 = vstv %s1337_s6  ;;  %vm516_vm6 = vcmp.ge.s32.totalorder %v484_v3, %v515_v26  ;;  %v512_v32 = vsel %vm511_vm5, 1, %v1169_v12  ;;  %v383_v48 = vrot.slane %v382_v41, 2 }
  0x45   : > { %v503_v30 = vadd.s32 %v502_v22, %v498_v25  ;;  %vm521_vm7 = vcmp.ge.s32.totalorder %v484_v3, %v520_v28  ;;  %v517_v39 = vsel %vm516_vm6, 1, %v1169_v12  ;;  %v433_v50 = vadd.f32 %v432_v43, %v431_v36 }
  0x46   : > { %v522_v46 = vsel %vm521_vm7, 1, %v1169_v12  ;;  %v428_v53 = vadd.f32 %v427_v40, %v426_v33  ;;  %v384_v54 = vadd.f32 %v383_v48, %v382_v41  ;;  %v404_v59 = vrot.slane %v403_v52, 2 }
  0x47   : > { %v508_v35 = vadd.s32 %v507_v27, %v503_v30  ;;  %v434_v57 = vrot.slane %v433_v50, 1  ;;  %v398_v0 = vadd.f32 %v397_v58, %v396_v51  ;;  %v1171_v3 = vmov 0.0  }
  0x48   : > { %v385_v60 = vrot.slane %v384_v54, 1  ;;  %v405_v1 = vadd.f32 %v404_v59, %v403_v52  ;;  %v417_v15 = vadd.f32 %v416_v61, %v415_v55  ;;  %v387_v20 = vmul.f32 %v1331_v5, %v1345_v11 }
  0x49   : > { %v513_v42 = vadd.s32 %v512_v32, %v508_v35  ;;  %v435_v63 = vadd.f32 %v434_v57, %v433_v50  ;;  %v399_v12 = vrot.slane %v398_v0, 1  ;;  %v408_v26 = vmul.f32 %v1335_v7, %v1333_v6 }
  0x4a   : > { %v1367_v8 = vadd.f32 %v385_v60, %v384_v54  ;;  %v406_v14 = vrot.slane %v405_v1, 1  ;;  %v418_v21 = vrot.slane %v417_v15, 2  ;;  %v388_v5 = vrot.slane %v387_v20, 4 }
  0x4b   : > { %v518_v49 = vadd.s32 %v517_v39, %v513_v42  ;;  %v478_v10 = vsel %vm464_vm8, %v428_v53, %v435_v63  ;;  %v1374_v17 = vadd.f32 %v399_v12, %v398_v0  ;;  %v409_v32 = vrot.slane %v408_v26, 4 }
  0x4c   : > { %v1372_v13 = vand.u32 4294901760, %v478_v10  ;;  %v436_v18 = vadd.f32 8e-05, %v1367_v8  ;;  %v1384_v25 = vadd.f32 %v406_v14, %v405_v1  ;;  %v419_v27 = vadd.f32 %v418_v21, %v417_v15 }
  0x4d   : > { %v523_v56 = vadd.s32 %v522_v46, %v518_v49  ;;  %v437_v23 = vadd.f32 8e-05, %v1374_v17  ;;  %v389_v7 = vadd.f32 %v388_v5, %v387_v20  ;;  %v410_v35 = vadd.f32 %v409_v32, %v408_v26 }
  0x4e   : > { %v1378_v19 = vsub.f32 %v478_v10, %v1372_v13  ;;  %v420_v11 = vrot.slane %v419_v27, 1  ;;  %v450_v6 = vadd.f32 8e-05, %v1384_v25  ;;  %vm466_vm0 = vcmask 1041408  }
  0x4f   : > { %vm1358_vm9 = vcmp.eq.s32.totalorder %v523_v56, %v525_v47  ;;  %v438_v29 = vmul.f32 %v437_v23, %v436_v18  ;;  %v390_v38 = vrot.slane %v389_v7, 2  ;;  %v411_v40 = vrot.slane %v410_v35, 2 }
  0x50   : > { %894 = vmatpush.xpose.msk.msra.mxu2 %vm1358_vm9, %v1170_v2  ;;  %v887_v4 = vsel %vm1358_vm9, 1.0, %v1171_v3  ;;  %888 = vmatpush.xpose.msk.msra.mxu0 %vm1358_vm9, %v1170_v2  ;;  %v556_v24 = vand.u32 4294901760, %v1378_v19  ;;  %v421_v33 = vadd.f32 %v420_v11, %v419_v27  ;;  %vm468_vm1 = vcmask 1042432  }
  0x51   : > { %v579_v9 = vsub.f32 %v887_v4, %v887_v4  ;;  %970 = vrsqrt.f32 %v438_v29  ;;  %v391_v42 = vadd.f32 %v390_v38, %v389_v7  ;;  %v412_v45 = vadd.f32 %v411_v40, %v410_v35 }
  0x52   : > { %v557_v30 = vsub.f32 %v1378_v19, %v556_v24  ;;  %v451_v34 = vadd.f32 8e-05, %v421_v33  ;;  %vm445_vm10 = vweird.f32 %v438_v29  ;;  %vm470_vm2 = vcmask 1043456  }
  0x53   : > { %v580_v16 = vand.u32 4294901760, %v579_v9  ;;  %v392_v48 = vrot.slane %v391_v42, 1  ;;  %v413_v51 = vrot.slane %v412_v45, 1  ;;  %vm472_vm3 = vcmask 1044480  }
  0x54   : > { %610 = vmatpush.xpose.msrb.mxu2 %v579_v9  ;;  %v558_v31 = vand.u32 4294901760, %v557_v30  ;;  %v452_v36 = vmul.f32 %v451_v34, %v450_v6  ;;  %vm474_vm4 = vcmask 1045504   ;;  %vm476_vm5 = vcmask 1046528  }
  0x55   : > { %v581_v22 = vsub.f32 %v579_v9, %v580_v16  ;;  %670 = vmatpush.xpose.msrb.mxu0 %v580_v16  ;;  %v393_v53 = vadd.f32 %v392_v48, %v391_v42  ;;  %v414_v56 = vadd.f32 %v413_v51, %v412_v45  ;;  %vm372_vm6 = vcmask 64512  }
  0x56   : > { %559 = vmatmul.f32.vlgmr.msra.gmra.mxu2 %v558_v31  ;;  %972 = vrsqrt.f32 %v452_v36  ;;  %vm459_vm13 = vweird.f32 %v452_v36  ;;  %373 = vst.msk [vmem:[%s1411_s12] sm:$0xff] %vm372_vm6, %v1171_v3  ;;  %vm374_vm7 = vcmask 58368  }
  0x57   : > { %v582_v28 = vand.u32 4294901760, %v581_v22  ;;  %v971_v37 = vpop.eup %970  ;;  %375 = vst.msk [vmem:[%s1411_s12 + $0x8] sm:$0x3] %vm374_vm7, %v1171_v3 }
  0x58   : > { %v440_v39 = vmul.f32 %v971_v37, %v438_v29  ;;  %vm446_vm11 = vweird.f32 %v971_v37 }
  0x59   : > { %895 = vmatpush.xpose.msra.mxu3 %v582_v28  ;;  %583 = vmatpush.xpose.msra.mxu1 %v582_v28  ;;  %vm447_vm12 = vmor %vm445_vm10, %vm446_vm11 }
  0x5a   : > { %v441_v41 = vmul.f32 %v971_v37, %v440_v39 }
  0x5c   : > { %589 = vmatmul.f32.vlgmr.msra.gmra.mxu3 %v1372_v13  ;;  %v442_v43 = vmul.f32 0.5, %v441_v41  ;;  %v973_v44 = vpop.eup %972 }
  0x5d   : > { %889 = vmatpush.xpose.msk.msrb.mxu3 %vm1358_vm9, %v1170_v2  ;;  %890 = vmatpush.xpose.msk.msrb.mxu1 %vm1358_vm9, %v1170_v2  ;;  %v454_v47 = vmul.f32 %v973_v44, %v452_v36  ;;  %vm460_vm14 = vweird.f32 %v973_v44  ;;  %v706_v28 = vld [vmem:[%s1411_s12] sm:$0xff] }
  0x5e   : > { %v443_v46 = vsub.f32 1.5, %v442_v43  ;;  %vm461_vm15 = vmor %vm459_vm13, %vm460_vm14  ;;  %v707_v6 = vld [vmem:[%s1411_s12 + $0x8] sm:$0x3] }
  0x5f   : > { %v455_v50 = vmul.f32 %v973_v44, %v454_v47 }
  0x60   : > { %v444_v49 = vmul.f32 %v971_v37, %v443_v46 }
  0x61   : > { %v456_v52 = vmul.f32 0.5, %v455_v50 }
  0x62   : > { %v448_v54 = vsel %vm447_vm12, %v971_v37, %v444_v49 }
  0x63   : > { %v457_v55 = vsub.f32 1.5, %v456_v52  ;;  %v449_v58 = vmul.f32 %v448_v54, %v393_v53 }
  0x65   : > { %v458_v57 = vmul.f32 %v973_v44, %v457_v55 }
  0x67   : > { %v462_v59 = vsel %vm461_vm15, %v973_v44, %v458_v57 }
  0x68   : > { %v463_v60 = vmul.f32 %v462_v59, %v414_v56 }
  0x6a   : > { %v465_v61 = vsel %vm464_vm8, %v449_v58, %v463_v60 }
  0x6b   : > { %v467_v62 = vsel %vm466_vm0, %v465_v61, %v1367_v8 }
  0x6c   : > { %v469_v63 = vsel %vm468_vm1, %v467_v62, %v393_v53 }
  0x6d   : > { %v471_v0 = vsel %vm470_vm2, %v469_v63, %v1374_v17 }
  0x6e   : > { %v473_v1 = vsel %vm472_vm3, %v471_v0, %v1384_v25 }
  0x6f   : > { %v475_v2 = vsel %vm474_vm4, %v473_v1, %v414_v56 }
  0x70   : > { %v477_v4 = vsel %vm476_vm5, %v475_v2, %v421_v33 }
  0x71   : > { %v546_v9 = vand.u32 4294901760, %v477_v4 }
  0x73   : > { %v547_v10 = vsub.f32 %v477_v4, %v546_v9  ;;  %585 = vmatmul.f32.vlgmr.msra.gmra.mxu1 %v546_v9 }
  0x75   : > { %613 = vmatmul.f32.vlgmr.msrb.gmra.mxu2 %v547_v10  ;;  %v548_v12 = vand.u32 4294901760, %v547_v10 }
  0x77   : > { %642 = vmatmul.f32.vlgmr.msrb.gmra.mxu3 %v548_v12  ;;  %v549_v14 = vsub.f32 %v547_v10, %v548_v12 }
  0x79   : > { %v550_v8 = vand.u32 4294901760, %v549_v14 }
  0x7b   : > { %551 = vmatmul.f32.vlgmr.msra.gmra.mxu0 %v550_v8  ;;  %698 = vmatmul.f32.vlgmr.msrb.gmra.mxu1 %v546_v9 }
  0x7d   : > { %618 = vmatmul.f32.gmra.mxu2 %v1378_v19 }
  0x7f   : > { %648 = vmatmul.f32.gmra.mxu3 %v556_v24 }
  0x83   : > { %672 = vmatmul.f32.vlgmr.msrb.gmra.mxu0 %v546_v9  ;;  %702 = vmatmul.f32.gmra.mxu1 %v1372_v13 }
  0x8b   : > { %676 = vmatmul.f32.gmra.mxu0 %v1372_v13 }
  0xd9   : > { %v560_v13 = vpop.f32.mrf.mxu2 }
  0xdf   : > { %v590_v15 = vpop.f32.mrf.mxu3 }
  0xe0   : > { %v591_v26 = vadd.f32 %v590_v15, %v560_v13 }
  0xf0   : > { %v586_v16 = vpop.f32.mrf.mxu1 }
  0xf8   : > { %v552_v17 = vpop.f32.mrf.mxu0  ;;  %v614_v18 = vpop.f32.mrf.mxu2 }
  0xf9   : > { %v587_v19 = vadd.f32 %v586_v16, %v552_v17  ;;  %v699_v22 = vpop.f32.mrf.mxu1 }
  0xfa   : > { %v643_v20 = vpop.f32.mrf.mxu3 }
  0xfb   : > { %v615_v21 = vadd.f32 %v614_v18, %v587_v19 }
  0xfd   : > { %v644_v23 = vadd.f32 %v643_v20, %v615_v21 }
 0x100   : > { %v619_v24 = vpop.f32.mrf.mxu2  ;;  %v673_v25 = vpop.f32.mrf.mxu0 }
 0x101   : > { %v674_v27 = vadd.f32 %v673_v25, %v644_v23  ;;  %v620_v29 = vadd.f32 %v619_v24, %v591_v26  ;;  %v703_v32 = vpop.f32.mrf.mxu1 }
 0x102   : > { %v649_v30 = vpop.f32.mrf.mxu3 }
 0x103   : > { %v700_v3 = vadd.f32 %v699_v22, %v674_v27  ;;  %v650_v11 = vadd.f32 %v649_v30, %v620_v29 }
 0x105   : > { %v708_v5 = vadd.f32 %v706_v28, %v700_v3 }
 0x107   : > { %711 = vst.msk [vmem:[%s1411_s12] sm:$0xff] %vm372_vm6, %v708_v5 }
 0x108   : > { %v677_v31 = vpop.f32.mrf.mxu0 }
 0x109   : > { %v678_v33 = vadd.f32 %v677_v31, %v650_v11 }
 0x10b   : > { %v704_v7 = vadd.f32 %v703_v32, %v678_v33 }
 0x10d   : > { %v709_v34 = vadd.f32 %v707_v6, %v704_v7 }
 0x10f   : > { %713 = vst.msk [vmem:[%s1411_s12 + $0x8] sm:$0x3] %vm374_vm7, %v709_v34 }
 0x110 PF: > { %s32_s26 = sadd.s32 1, %s1166_s26   ;;  %s1462_s27 = sld [smem:[#allocation15_spill]] }
 0x111   : > { %p29_p0 = scmp.ge.s32.totalorder %s32_s26, 4   ;;  %s1463_s22 = smov %s1150_s23 }
 0x112   : > { %s1464_s23 = smov %s1154_s24  ;;  %s1465_s24 = smov %s1252_s7 }
 0x113   : > { %s1466_s25 = smov %s1162_s0  ;;  %31 = sbr.rel (!%p29_p0) target bundleno = 15 (0xf), region = 117 }
 0x116   : > { %s1467_s0 = smov %s1462_s27 }
 0x118   :  { %735 = vsyncpa [#allocation5], 1 }
 0x119   :  { %737 = vsyncpa [#allocation5 + $0x1], 1 }
 0x11a   :  { %738 = vsyncpa [#allocation7], 1 }
 0x11b   :  { %740 = vsyncpa [#allocation7 + $0x1], 1 }
 0x11c   :  { %741 = vsyncpa [#allocation10], 1 }
 0x11d   :  { %743 = vsyncpa [#allocation10 + $0x1], 1 }

</bundles_post_ra>
